<compile_context>
chip_gen: v5e
topology: v5e:2x2
jax: 0.10.0
libtpu: 0.0.40
codegen_flags: <defaults>
</compile_context>

<pallas_src>
import functools

import numpy as np
import jax
import jax.numpy as jnp
from jax import lax
from jax.experimental import pallas as pl
from jax.experimental.pallas import tpu as pltpu

EPS = 1e-5          # nn.InstanceNorm3d default eps
KSIZE = 3
NTAPS = KSIZE * KSIZE
_SUB = 8            # f32 sublane tile


def _round_up(v, k):
    return (v + k - 1) // k * k


# --------------------------- roll-direction probe ----------------------------
_ROLL_SIGN = None


def _roll_sign():
    """Return s such that pltpu.roll(x, (s*delta) % n, axis=-1)[..., i] == x[..., i+delta]."""
    global _ROLL_SIGN
    if _ROLL_SIGN is None:
        def probe(x_ref, o_ref):
            o_ref[...] = pltpu.roll(x_ref[...], 1, axis=1)

        x = jnp.broadcast_to(jnp.arange(128, dtype=jnp.float32), (8, 128))
        out = pl.pallas_call(
            probe, out_shape=jax.ShapeDtypeStruct((8, 128), jnp.float32))(x)
        v = float(jax.device_get(out)[0, 0])
        # np.roll convention: out[0] == x[127] -> need shift = -delta; else +delta.
        _ROLL_SIGN = -1 if v > 64.0 else 1
    return _ROLL_SIGN


# ----------------------------- Pallas kernel --------------------------------
def _fused_kernel(x_ref, mask_ref, *args, meta, ww, eps, roll_sign):
    # x_ref    : (1, RP0, M)  one sample; channels*depth on sublanes, M = H*W on lanes
    # mask_ref : (4, M)       0/1 rows: h==0, h==H-1, w==0, w==W-1
    # args     : per layer [w_cat_ref (+ grp_ref if d_out > 1)], then o_ref (last)
    # meta     : static per-layer (d_out, use_grp)
    refs = list(args)
    o_ref = refs.pop()
    layer_refs = []
    for (_d_out, use_grp) in meta:
        w_ref = refs.pop(0)
        g_ref = refs.pop(0) if use_grp else None
        layer_refs.append((w_ref, g_ref))

    m = x_ref.shape[-1]
    mk = mask_ref[...]                      # (4, M) float32 0/1
    h_first = mk[0:1, :]
    h_last = mk[1:2, :]
    w_first = mk[2:3, :]
    w_last = mk[3:4, :]

    def shift(z, delta):
        # z[..., i] <- z[..., i + delta]  (cyclic; wrap positions are masked out)
        amt = (roll_sign * delta) % m
        if amt == 0:
            return z
        return pltpu.roll(z, amt, axis=1)

    def blend(mask_row, keep, moved):
        # replication padding: keep the un-shifted value at the boundary lanes
        return mask_row * keep + (1.0 - mask_row) * moved

    cur = x_ref[0].astype(jnp.float32)      # (RP_in, M)

    for (d_out, use_grp), (w_ref, g_ref) in zip(meta, layer_refs):
        # --- 3x3 spatial taps: XLU lane rolls + VPU boundary blend -----------
        zs = (blend(h_first, cur, shift(cur, -ww)),   # kh = 0 : row h-1 (clamped)
              cur,                                    # kh = 1
              blend(h_last, cur, shift(cur, ww)))     # kh = 2 : row h+1 (clamped)
        taps = []
        for z in zs:
            taps.append(blend(w_first, z, shift(z, -1)))   # kw = 0
            taps.append(z)                                  # kw = 1
            taps.append(blend(w_last, z, shift(z, 1)))      # kw = 2
        x9 = jnp.concatenate(taps, axis=0)            # (9*RP_in, M), 8-aligned blocks

        # --- conv as ONE wide matmul (depth taps folded into w_cat host-side) ---
        acc = jnp.dot(w_ref[...], x9,
                      preferred_element_type=jnp.float32)   # (RP_out, M)

        # --- InstanceNorm3d(affine=False) over (d_out, H, W) per channel, ReLU ---
        inv_n = 1.0 / (d_out * m)
        row_sum = jnp.sum(acc, axis=1, keepdims=True)        # (RP_out, 1) lane reduce
        if use_grp:
            mean = jnp.dot(g_ref[...], row_sum,
                           preferred_element_type=jnp.float32) * inv_n
        else:
            mean = row_sum * inv_n
        centered = acc - mean
        sq_sum = jnp.sum(centered * centered, axis=1, keepdims=True)
        if use_grp:
            var = jnp.dot(g_ref[...], sq_sum,
                          preferred_element_type=jnp.float32) * inv_n
        else:
            var = sq_sum * inv_n
        cur = jnp.maximum(centered * lax.rsqrt(var + eps), 0.0)

    o_ref[0] = cur.astype(o_ref.dtype)


# ------------------------------ host-side glue --------------------------------
def _expand_depth_weight(w, d_in):
    """Fold the depth (kd) taps of a (O, I, 3, 3, 3) weight into a banded matrix per
    spatial tap: (9, O*D_out, I*D_in); entry [tap, o*D_out+do, c*D_in+d] = W[o,c,d-do,kh,kw]."""
    w = np.asarray(w, dtype=np.float32)
    c_out, c_in = int(w.shape[0]), int(w.shape[1])
    d_out = d_in - (KSIZE - 1)
    w_exp = np.zeros((NTAPS, c_out * d_out, c_in * d_in), np.float32)
    for kh in range(KSIZE):
        for kw in range(KSIZE):
            tap = kh * KSIZE + kw
            for do in range(d_out):
                for kd in range(KSIZE):
                    d = do + kd
                    w_exp[tap, do::d_out, d::d_in] = w[:, :, kd, kh, kw]
    return w_exp, c_out, d_out


def _build_layer_tables(w, d_in):
    """w_cat: (RP_out, 9*RP_in) with zero rows/cols at the sublane padding;
    grp: (RP_out, RP_out) block-diagonal channel-group sum matrix (None if d_out==1)."""
    w_exp, c_out, d_out = _expand_depth_weight(w, d_in)
    rows_out, rows_in = int(w_exp.shape[1]), int(w_exp.shape[2])
    rp_out, rp_in = _round_up(rows_out, _SUB), _round_up(rows_in, _SUB)
    w_pad = np.zeros((NTAPS, rp_out, rp_in), np.float32)
    w_pad[:, :rows_out, :rows_in] = w_exp
    w_cat = np.ascontiguousarray(
        np.transpose(w_pad, (1, 0, 2))).reshape(rp_out, NTAPS * rp_in)
    grp = None
    if d_out > 1:
        g = np.kron(np.eye(c_out, dtype=np.float32),
                    np.ones((d_out, d_out), np.float32))
        grp = np.zeros((rp_out, rp_out), np.float32)
        grp[:rows_out, :rows_out] = g
    return w_cat, grp, (c_out, d_out, rows_out, rp_out, rp_in)


def _boundary_masks(hh, ww):
    mm = np.arange(hh * ww)
    h_of, w_of = mm // ww, mm % ww
    return jnp.asarray(np.stack([h_of == 0, h_of == hh - 1,
                                 w_of == 0, w_of == ww - 1]).astype(np.float32))


def depth_reduce_simple_forward(x, params, *, eps=EPS):
    """Forward of Depth_reduce_simple.  x: (N, C_in, D, H, W); params: [(w, b), ...].
    The conv bias is ignored: InstanceNorm3d(affine=False) cancels it exactly."""
    if not params:
        return x
    n, c0, d0, hh, ww = map(int, x.shape)
    m = hh * ww
    sign = _roll_sign()

    w_cats, grps, meta = [], [], []
    d_in = d0
    for (w, _b) in params:
        w_cat, grp, (c_out, d_out, rows_out, rp_out, rp_in) = _build_layer_tables(w, d_in)
        w_cats.append(jnp.asarray(w_cat))
        grps.append(None if grp is None else jnp.asarray(grp))
        meta.append((d_out, grp is not None))
        d_in = d_out
        last = (c_out, d_out, rows_out, rp_out)
    c_last, d_last, rows_last, rp_last = last
    rp0 = int(w_cats[0].shape[1]) // NTAPS

    # Per-sample 2-D slab: channels*depth on sublanes (zero-padded to a multiple
    # of 8), H*W on lanes.
    x2d = x.reshape(n, c0 * d0, m).astype(jnp.float32)
    if rp0 > c0 * d0:
        x2d = jnp.concatenate(
            [x2d, jnp.zeros((n, rp0 - c0 * d0, m), jnp.float32)], axis=1)
    masks = _boundary_masks(hh, ww)

    in_specs = [pl.BlockSpec((1, rp0, m), lambda i: (i, 0, 0)),
                pl.BlockSpec((4, m), lambda i: (0, 0))]
    call_args = [x2d, masks]
    for w_cat, grp in zip(w_cats, grps):
        in_specs.append(pl.BlockSpec(w_cat.shape, lambda i: (0, 0)))
        call_args.append(w_cat)
        if grp is not None:
            in_specs.append(pl.BlockSpec(grp.shape, lambda i: (0, 0)))
            call_args.append(grp)

    # Explicit VMEM budget: double-buffered blocks + weights + in-kernel temporaries.
    est = 4 * (2 * rp0 * m + 2 * rp_last * m + 4 * m)
    est += sum(2 * 4 * int(np.prod(w.shape)) for w in w_cats)
    est += sum(0 if g is None else 2 * 4 * int(np.prod(g.shape)) for g in grps)
    tmp = 0
    for w_cat in w_cats:
        rpo, k = int(w_cat.shape[0]), int(w_cat.shape[1])
        tmp = max(tmp, 4 * m * (2 * k + 4 * (k // NTAPS) + 4 * rpo))
    vmem_limit = int(min(48 * 2 ** 20, max(8 * 2 ** 20, 2 * (est + tmp))))

    # TODO(synk): for large batches, fold several samples onto the lane axis per grid
    # step (with per-sample segment sums in the norm) to improve MXU fill further.
    out2d = pl.pallas_call(
        functools.partial(_fused_kernel, meta=tuple(meta), ww=ww, eps=eps,
                          roll_sign=sign),
        out_shape=jax.ShapeDtypeStruct((n, rp_last, m), jnp.float32),
        grid_spec=pltpu.PrefetchScalarGridSpec(
            num_scalar_prefetch=0,
            grid=(n,),
            in_specs=in_specs,
            out_specs=pl.BlockSpec((1, rp_last, m), lambda i: (i, 0, 0)),
        ),
        compiler_params=pltpu.CompilerParams(
            dimension_semantics=("parallel",),
            vmem_limit_bytes=vmem_limit),
    )(*call_args)

    return out2d[:, :rows_last, :].reshape(n, c_last, d_last, hh, ww)


def init_params(channels_in, channels_2d_to_3d, slices, key):
    if slices == 1:
        in_channels = []
    else:
        in_channels = [channels_in] + [channels_2d_to_3d] * (slices // 2 - 1)
    params = []
    for c_in in in_channels:
        key, kw, kb = jax.random.split(key, 3)
        fan_in = c_in * KSIZE ** 3
        bound = 1.0 / float(np.sqrt(fan_in))
        w = jax.random.uniform(kw, (channels_2d_to_3d, c_in, KSIZE, KSIZE, KSIZE),
                               jnp.float32, -bound, bound)
        b = jax.random.uniform(kb, (channels_2d_to_3d,), jnp.float32, -bound, bound)
        params.append((w, b))
    return params


# ----------------------------- reference (pure JAX) ----------------------------
def _replication_pad_hw(x):
    # ReplicationPad3d((1, 1, 1, 1, 0, 0)): pad W and H by 1 on each side, D untouched.
    return jnp.pad(x, ((0, 0), (0, 0), (0, 0), (1, 1), (1, 1)), mode="edge")


def _ref_layer(x, w, b, eps=EPS):
    xp = _replication_pad_hw(x)
    y = jax.lax.conv_general_dilated(
        xp, w, window_strides=(1, 1, 1), padding="VALID",
        dimension_numbers=("NCDHW", "OIDHW", "NCDHW"))
    y = y + b[None, :, None, None, None]
    mean = jnp.mean(y, axis=(2, 3, 4), keepdims=True)
    var = jnp.mean((y - mean) ** 2, axis=(2, 3, 4), keepdims=True)
    y = (y - mean) * jax.lax.rsqrt(var + eps)
    return jnp.maximum(y, 0.0)


def _ref_forward(x, params):
    out = x
    for (w, b) in params:
        out = _ref_layer(out, w, b)
    return out


# --------------------------------- main ---------------------------------------
if __name__ == "__main__":
    # slices=5 => D=5 and two depth-reducing layers: D 5 -> 3 -> 1.
    N, C_IN, D, H, W = 2, 4, 5, 16, 16
    C_MID = 8          # channels_2d_to_3d
    SLICES = 5

    key = jax.random.PRNGKey(0)
    key, kx = jax.random.split(key)
    x = jax.random.normal(kx, (N, C_IN, D, H, W), jnp.float32)
    params = init_params(C_IN, C_MID, SLICES, key)

    out = jax.block_until_ready(depth_reduce_simple_forward(x, params))
    assert out.shape == (N, C_MID, 1, H, W), out.shape

    ref = jax.block_until_ready(_ref_forward(x, params))
    assert jnp.allclose(out, ref, atol=5e-4, rtol=5e-4), (
        float(jnp.max(jnp.abs(out - ref))))

    print("KERNEL_OK")
</pallas_src>

<mosaic_0001>
module attributes {stable_mosaic.version = 11 : i64} {
  func.func @probe(%arg0: memref<8x128xf32, #tpu.memory_space<vmem>>, %arg1: memref<8x128xf32, #tpu.memory_space<vmem>>) attributes {dimension_semantics = [], scalar_prefetch = 0 : i64, scratch_operands = 0 : i64, tpu.core_type = #tpu.core_type<tc>} {
    %c0 = arith.constant 0 : index
    %c0_0 = arith.constant 0 : index
    %0 = vector.load %arg0[%c0, %c0_0] : memref<8x128xf32, #tpu.memory_space<vmem>>, vector<8x128xf32>
    %c1_i32 = arith.constant 1 : i32
    %1 = tpu.dynamic_rotate %0 by %c1_i32 dim 1 : vector<8x128xf32>, i32 -> vector<8x128xf32>
    %c0_1 = arith.constant 0 : index
    %c0_2 = arith.constant 0 : index
    %2 = vector.load %arg1[%c0_1, %c0_2] : memref<8x128xf32, #tpu.memory_space<vmem>>, vector<8x128xf32>
    tpu.vector_store %arg1[%c0_1, %c0_2], %1 {strides = array<i32>} : memref<8x128xf32, #tpu.memory_space<vmem>>, vector<8x128xf32>,
    return
  }
}

</mosaic_0001>

<bundles_post_ra>
// kernel: tpu_custom_call.1
= control target key start
LH: loop header
LB: loop body
LE: loop exit
PB: predicated region body
PF: predicated region fallthrough
CT: control target
= control target key end

     0   :  { %6 = vsyncpa [#allocation3], 0  ;;  %s118_s0 = inlined_call_operand.hbm [shape: f32[8,128], index: 0, kind: input, shape index: {}]   ;;  %s119_s1 = inlined_call_operand.hbm [shape: f32[8,128], index: 1, kind: output, shape index: {}]  }
   0x1   :  { %7 = vsyncpa [#allocation4], 0  ;;  %s13_s8 = sshll.u32 %s118_s0, 4  ;;  %s99_s9 = smov [#allocation2]   ;;  %s14_s8 = int_to_ptr.hbm [resolvable:$true] %s13_s8 }
   0x2   :  { %s15_s10 = sshll.u32 %s99_s9, 4  ;;  %s16_s10 = int_to_ptr.vmem [resolvable:$true] %s15_s10 }
   0x3   :  { %18 = dma.hbm_to_vmem [thread:$0]  %s14_s8, 128, %s16_s10, [#allocation3]  }
   0x4   :  { %95 = dma.done.wait [#allocation3], 128  }
   0x5   :  { %96 = vsyncadd [#allocation3], 4294967168  ;;  %v23_v0 = vld [vmem:[#allocation2] sm:$0xff]  ;;  %s100_s11 = smov 1   ;;  %s101_s12 = smov [#allocation5]  }
   0x6   :  { %24 = vrot.lane.b32.xlu0 %v23_v0, %s100_s11  ;;  %s32_s13 = sshll.u32 %s101_s12, 4  ;;  %s34_s16 = sshll.u32 %s119_s1, 4  ;;  %s33_s13 = int_to_ptr.vmem [resolvable:$true] %s32_s13  ;;  %s35_s16 = int_to_ptr.hbm [resolvable:$true] %s34_s16 }
  0x78   :  { %v25_v1 = vpop.permute.xlu0 %24 }
  0x79   :  { %26 = vst [vmem:[#allocation5] sm:$0xff] %v25_v1 }
  0x7a   :  { %37 = dma.vmem_to_hbm [thread:$0]  %s33_s13, 128, %s35_s16, [#allocation4]  }
  0x7b   :  { %97 = dma.done.wait [#allocation4], 128  }
  0x7c   :  { %98 = vsyncadd [#allocation4], 4294967168 }
  0x7d   :  { %42 = vsyncpa [#allocation3], 1 }
  0x7e   :  { %43 = vsyncpa [#allocation4], 1 }

</bundles_post_ra>
